<compile_context>
chip_gen: v7x
topology: tpu7x:2x2x1
jax: 0.10.0
libtpu: 0.0.40
codegen_flags: <defaults>
</compile_context>

<pallas_src>
import functools

import jax
import jax.numpy as jnp
from jax import lax
from jax.experimental import pallas as pl
from jax.experimental.pallas import tpu as pltpu


def _weiszfeld_kernel(x_ref, o_ref, *, iterations, n_valid, tb, precision):
    """Processes `tb` batch elements per grid step.

    x_ref: (tb, Cp, Np) VMEM tile -- channels on sublanes, positions on lanes.
    o_ref: (tb, 1, Cp) lane-dense output tile (per-channel geometric median).
    """
    n_pad = x_ref.shape[-1]
    f32 = jnp.float32
    bf16_in = x_ref.dtype == jnp.bfloat16
    # bf16 inputs feed the MXU natively (1-pass, f32 accumulation); f32 inputs
    # use whatever `precision` the wrapper requested (DEFAULT or HIGHEST).
    cdt = jnp.bfloat16 if bf16_in else f32
    prec = None if bf16_in else precision

    # Lane mask over valid spatial positions (only when N was padded to 128).
    # Mandatory: zero-padded *positions* are not a no-op for Weiszfeld -- they
    # would otherwise receive weight rsqrt(||median||^2 + eps) and drag the
    # median toward zero.
    if n_valid == n_pad:
        mask = None
    else:
        mask = (lax.broadcasted_iota(jnp.int32, (1, n_pad), 1)
                < n_valid).astype(f32)

    # Contract the lane (position) axes of both operands:
    # (1, Np) x (Cp, Np) -> (1, Cp).  Same NT orientation as attention q@k^T,
    # so the (Cp, Np) slab is consumed in its stored layout -- no transpose.
    nt_dims = (((1,), (1,)), ((), ()))

    def _process(t):
        x = x_ref[t]                                      # (Cp, Np) input dtype
        # Mean-center (translation-equivariant; the weight recurrence is
        # translation-invariant).  Conditions the ||x_i - m||^2 expansion
        # below against catastrophic cancellation.
        xf = x.astype(f32)
        mu = jnp.sum(xf, axis=1, keepdims=True) * (1.0 / n_valid)   # (Cp, 1)
        xf = xf - mu
        # MXU operand copy (aliases xf for f32 inputs; bf16 copy otherwise --
        # the transient f32 `xf` only feeds the hoisted xsq and this cast).
        xc = xf.astype(cdt)                               # (Cp, Np)
        # Hoisted per-position sum_c xc^2; must stay f32 for the rsqrt update.
        xsq = jnp.sum(xf * xf, axis=0, keepdims=True)     # (1, Np)

        def step(w):
            inv_denom = 1.0 / jnp.sum(w)   # one exact scalar reciprocal / iter
            med = lax.dot_general(w.astype(cdt), xc, nt_dims,
                                  preferred_element_type=f32,
                                  precision=prec) * inv_denom       # (1, Cp)
            cross = jnp.dot(med.astype(cdt), xc,
                            preferred_element_type=f32,
                            precision=prec)                         # (1, Np)
            # ||xc_i - med||^2 = sum_c xc^2 - 2 med.xc_i + ||med||^2
            d2 = jnp.maximum(xsq - 2.0 * cross + jnp.sum(med * med), 0.0)
            w_new = lax.rsqrt(d2 + 1e-10)                 # EUP slot
            if mask is not None:
                w_new = w_new * mask       # padded positions keep weight 0
            return w_new

        w0 = jnp.ones((1, n_pad), f32) if mask is None else mask
        if iterations <= 8 and n_pad <= 2048:
            # Small static trip count & modest vreg pressure -> unroll.
            w = w0
            for _ in range(iterations):
                w = step(w)
        else:
            # Bound live ranges for large N / iteration counts; carry only w.
            w = lax.fori_loop(0, iterations, lambda _, w_: step(w_), w0,
                              unroll=2)

        # Final median from the *original* (uncentered) x: no un-centering or
        # transpose needed, and (1, Cp) is lane-dense for the store.
        med = lax.dot_general(w.astype(cdt), x.astype(cdt), nt_dims,
                              preferred_element_type=f32,
                              precision=prec) * (1.0 / jnp.sum(w))  # (1, Cp)
        o_ref[t] = med.astype(o_ref.dtype)

    if tb <= 2:
        for t in range(tb):            # static indexing for tiny batch tiles
            _process(t)
    else:
        @pl.loop(0, tb)
        def _(t):
            _process(t)


def geometric_median_weiszfeld(x, *, iterations, intermediate_gradients=True,
                               matmul_precision=None):
    """x: (B, C, H, W) -> (B, C, 1, 1) geometric-median pooling."""
    # TODO(synk): intermediate_gradients only toggles .detach() (autograd-only);
    # forward values are identical, so it is a no-op here.
    del intermediate_gradients
    B, C, H, W = x.shape
    n = H * W

    # Channel padding to a sublane multiple: zero channels are an exact no-op
    # (they center to zero and contribute nothing to xsq / cross / the mean).
    c_pad = -(-C // 8) * 8
    # Spatial padding to a lane multiple: NOT a no-op -- the kernel masks the
    # padded positions out of the weights every iteration.
    n_pad = -(-n // 128) * 128
    x_flat = x.reshape(B, C, n)
    if c_pad != C or n_pad != n:
        x_flat = jnp.pad(x_flat, ((0, 0), (0, c_pad - C), (0, n_pad - n)))

    itemsize = x_flat.dtype.itemsize
    work_bytes = 4 if itemsize >= 4 else 6   # centered copy (+bf16 duplicate)
    per_elem_block = c_pad * n_pad * itemsize

    # Generation-aware VMEM cap (v7x: 64 MiB/TC; v5e/v6e: 128 MiB).
    try:
        phys_vmem = pltpu.get_tpu_info().vmem_capacity_bytes
    except Exception:
        phys_vmem = 64 * 1024 * 1024         # conservative fallback
    vmem_cap = int(0.80 * phys_vmem)

    def vmem_need(tb, buffers):
        return (buffers * tb * per_elem_block       # pipelined input blocks
                + c_pad * n_pad * work_bytes        # in-kernel centered copy
                + 16 * (n_pad + c_pad) * 4          # (1,N)/(1,Cp) temporaries
                + 4 * tb * c_pad * 4                # output blocks
                + (2 << 20))                        # Mosaic scratch headroom

    # Batch-tile TB elements per grid step: amortizes the ~0.35us/step overhead
    # and enlarges DMAs, but keeps >= 2 grid steps when B > 1 so the "parallel"
    # batch axis can still feed both TensorCores on megacore parts.
    tb = 1
    for cand in range(1, B + 1):
        if B % cand:
            continue
        if vmem_need(cand, 2) > vmem_cap:
            break
        if B > 1 and B // cand < 2:
            break
        tb = cand
        if cand * per_elem_block >= (2 << 20):
            break

    input_buffers = 2
    if vmem_need(tb, 2) > vmem_cap and vmem_need(tb, 1) <= vmem_cap:
        # Compute per block (>= `iterations` MXU sweeps) >> its DMA; single
        # buffering the input is the cheap way back under the VMEM cap.
        input_buffers = 1
    # TODO(synk): if even a single-buffered (c_pad, n_pad) block exceeds the
    # cap, switch to a chunked-spatial pipeline (memory_space=pl.ANY +
    # pltpu.emit_pipeline over N, carrying w / partial sums per iteration).
    vmem_limit = int(min(max(vmem_need(tb, input_buffers), 32 * 1024 * 1024),
                         vmem_cap))

    index_map = lambda b: (b, 0, 0)
    if input_buffers == 2:
        in_spec = pl.BlockSpec((tb, c_pad, n_pad), index_map)
    else:
        in_spec = pl.BlockSpec((tb, c_pad, n_pad), index_map,
                               pipeline_mode=pl.Buffered(1))

    out = pl.pallas_call(
        functools.partial(_weiszfeld_kernel, iterations=iterations,
                          n_valid=n, tb=tb, precision=matmul_precision),
        out_shape=jax.ShapeDtypeStruct((B, 1, c_pad), x.dtype),
        grid_spec=pltpu.PrefetchScalarGridSpec(
            num_scalar_prefetch=0,
            grid=(B // tb,),
            in_specs=[in_spec],
            out_specs=pl.BlockSpec((tb, 1, c_pad), index_map),
        ),
        # TODO(synk): for B == 1 on v7x the second TensorCore is idle; a
        # pl.core_map spatial split (partial w.x / sum(w) reduced through CMEM
        # per iteration) would recover up to ~2x there.
        # TODO(synk): for small N and large C a gated Gram-matrix hoist
        # (G = xc.xc^T once; per-iteration cost independent of C) is a further
        # win, but it worsens d2 cancellation -- keep it gated off by default.
        compiler_params=pltpu.CompilerParams(
            dimension_semantics=("parallel",),
            vmem_limit_bytes=vmem_limit,
        ),
    )(x_flat)
    return out[:, :, :C].reshape(B, C, 1, 1)


def _reference(x, iterations):
    """Pure-JAX f32 reference (per-batch generalization of the torch forward)."""
    xf = x.astype(jnp.float32)
    B, C, H, W = x.shape
    w = jnp.ones((B, 1, H, W), jnp.float32)
    for _ in range(iterations):
        denom = jnp.sum(w, axis=(1, 2, 3), keepdims=True)
        median = jnp.sum(xf * w, axis=(2, 3), keepdims=True) / denom
        w = 1.0 / jnp.sqrt(
            jnp.sum((xf - median) ** 2, axis=1, keepdims=True) + 1e-10)
    denom = jnp.sum(w, axis=(1, 2, 3), keepdims=True)
    median = jnp.sum(xf * w, axis=(2, 3), keepdims=True) / denom
    return median.astype(x.dtype)


if __name__ == "__main__":
    iterations = 3
    k0, k1, k2 = jax.random.split(jax.random.PRNGKey(0), 3)

    # Case 1: lane-aligned spatial extent (16*16 = 256), default MXU precision.
    x1 = jax.random.normal(k0, (2, 4, 16, 16), dtype=jnp.float32)
    out1 = jax.block_until_ready(
        geometric_median_weiszfeld(x1, iterations=iterations,
                                   intermediate_gradients=True))
    ref1 = _reference(x1, iterations)
    assert out1.shape == (2, 4, 1, 1), out1.shape
    assert jnp.allclose(out1, ref1, atol=2e-3, rtol=2e-3), (out1, ref1)

    # Case 2: non-aligned spatial extent (14*14 = 196 -> padded+masked to 256),
    # odd channel count (3 -> padded to 8), B=4 so two batch elements share a
    # grid step, HIGHEST precision for a tight check against the f32 reference.
    x2 = jax.random.normal(k1, (4, 3, 14, 14), dtype=jnp.float32)
    out2 = jax.block_until_ready(
        geometric_median_weiszfeld(x2, iterations=iterations,
                                   intermediate_gradients=False,
                                   matmul_precision=jax.lax.Precision.HIGHEST))
    ref2 = _reference(x2, iterations)
    assert out2.shape == (4, 3, 1, 1), out2.shape
    assert jnp.allclose(out2, ref2, atol=5e-5, rtol=5e-5), (out2, ref2)

    # Case 3: bf16 inputs exercise the native-bf16 MXU path.
    x3 = jax.random.normal(k2, (2, 4, 16, 16), dtype=jnp.bfloat16)
    out3 = jax.block_until_ready(
        geometric_median_weiszfeld(x3, iterations=iterations))
    ref3 = _reference(x3, iterations)
    assert out3.shape == (2, 4, 1, 1), out3.shape
    assert jnp.allclose(out3.astype(jnp.float32), ref3.astype(jnp.float32),
                        atol=5e-3, rtol=5e-3), (out3, ref3)

    print("KERNEL_OK")
</pallas_src>

<mosaic_0001>
module attributes {stable_mosaic.version = 11 : i64} {
  func.func @_weiszfeld_kernel(%arg0: i32, %arg1: memref<1x8x256xf32, #tpu.memory_space<vmem>>, %arg2: memref<1x1x8xf32, #tpu.memory_space<vmem>>) attributes {dimension_semantics = [#tpu.dimension_semantics<parallel>], iteration_bounds = array<i64: 2>, scalar_prefetch = 0 : i64, scratch_operands = 0 : i64, tpu.core_type = #tpu.core_type<tc>, window_params = [{transform_indices = @transform_0, window_bounds = array<i64: 1, 8, 256>}, {transform_indices = @transform_1, window_bounds = array<i64: 1, 1, 8>}]} {
    %c0 = arith.constant 0 : index
    %c0_0 = arith.constant 0 : index
    %c0_1 = arith.constant 0 : index
    %0 = vector.load %arg1[%c0, %c0_0, %c0_1] : memref<1x8x256xf32, #tpu.memory_space<vmem>>, vector<1x8x256xf32>
    %1 = vector.shape_cast %0 : vector<1x8x256xf32> to vector<8x256xf32>
    %cst = arith.constant dense<0.000000e+00> : vector<8xf32>
    %2 = vector.multi_reduction <add>, %1, %cst [1] : vector<8x256xf32> to vector<8xf32>
    %3 = vector.shape_cast %2 : vector<8xf32> to vector<8x1xf32>
    %cst_2 = arith.constant 3.906250e-03 : f32
    %4 = vector.broadcast %cst_2 : f32 to vector<8x1xf32>
    %5 = arith.mulf %3, %4 : vector<8x1xf32>
    %6 = vector.broadcast %5 : vector<8x1xf32> to vector<8x256xf32>
    %7 = arith.subf %1, %6 : vector<8x256xf32>
    %8 = arith.mulf %7, %7 : vector<8x256xf32>
    %cst_3 = arith.constant dense<0.000000e+00> : vector<256xf32>
    %9 = vector.multi_reduction <add>, %8, %cst_3 [0] : vector<8x256xf32> to vector<256xf32>
    %10 = vector.shape_cast %9 : vector<256xf32> to vector<1x256xf32>
    %cst_4 = arith.constant 1.000000e+00 : f32
    %11 = vector.broadcast %cst_4 : f32 to vector<1x256xf32>
    %12 = vector.shape_cast %11 : vector<1x256xf32> to vector<1x1x256xf32>
    %cst_5 = arith.constant dense<0.000000e+00> : vector<1xf32>
    %13 = vector.multi_reduction <add>, %12, %cst_5 [1, 2] : vector<1x1x256xf32> to vector<1xf32>
    %14 = vector.shape_cast %13 : vector<1xf32> to vector<1x1x1xf32>
    %15 = vector.extract %14[0, 0, 0] : f32 from vector<1x1x1xf32>
    %cst_6 = arith.constant 1.000000e+00 : f32
    %16 = arith.divf %cst_6, %15 : f32
    %cst_7 = arith.constant dense<0.000000e+00> : vector<1x8xf32>
    %17 = tpu.matmul %11, %7, %cst_7 {dimension_numbers = #tpu.dot_dimension_numbers<[1], [1], [0], [0], [0, 0, 1, 0], [], []>} : vector<1x256xf32>, vector<8x256xf32>, vector<1x8xf32> -> vector<1x8xf32>
    %18 = vector.broadcast %16 : f32 to vector<1x8xf32>
    %19 = arith.mulf %17, %18 : vector<1x8xf32>
    %cst_8 = arith.constant dense<0.000000e+00> : vector<1x256xf32>
    %20 = tpu.matmul %19, %7, %cst_8 {dimension_numbers = #tpu.dot_dimension_numbers<[1], [0], [0], [1], [0, 0, 1, 1], [], []>} : vector<1x8xf32>, vector<8x256xf32>, vector<1x256xf32> -> vector<1x256xf32>
    %cst_9 = arith.constant 2.000000e+00 : f32
    %21 = vector.broadcast %cst_9 : f32 to vector<1x256xf32>
    %22 = arith.mulf %21, %20 : vector<1x256xf32>
    %23 = arith.subf %10, %22 : vector<1x256xf32>
    %24 = arith.mulf %19, %19 : vector<1x8xf32>
    %25 = vector.shape_cast %24 : vector<1x8xf32> to vector<1x1x8xf32>
    %cst_10 = arith.constant dense<0.000000e+00> : vector<1xf32>
    %26 = vector.multi_reduction <add>, %25, %cst_10 [1, 2] : vector<1x1x8xf32> to vector<1xf32>
    %27 = vector.shape_cast %26 : vector<1xf32> to vector<1x1x1xf32>
    %28 = vector.extract %27[0, 0, 0] : f32 from vector<1x1x1xf32>
    %29 = vector.broadcast %28 : f32 to vector<1x256xf32>
    %30 = arith.addf %23, %29 : vector<1x256xf32>
    %cst_11 = arith.constant 0.000000e+00 : f32
    %31 = vector.broadcast %cst_11 : f32 to vector<1x256xf32>
    %32 = arith.maximumf %30, %31 : vector<1x256xf32>
    %cst_12 = arith.constant 1.000000e-10 : f32
    %33 = vector.broadcast %cst_12 : f32 to vector<1x256xf32>
    %34 = arith.addf %32, %33 : vector<1x256xf32>
    %35 = math.rsqrt %34 : vector<1x256xf32>
    %36 = vector.shape_cast %35 : vector<1x256xf32> to vector<1x1x256xf32>
    %cst_13 = arith.constant dense<0.000000e+00> : vector<1xf32>
    %37 = vector.multi_reduction <add>, %36, %cst_13 [1, 2] : vector<1x1x256xf32> to vector<1xf32>
    %38 = vector.shape_cast %37 : vector<1xf32> to vector<1x1x1xf32>
    %39 = vector.extract %38[0, 0, 0] : f32 from vector<1x1x1xf32>
    %cst_14 = arith.constant 1.000000e+00 : f32
    %40 = arith.divf %cst_14, %39 : f32
    %cst_15 = arith.constant dense<0.000000e+00> : vector<1x8xf32>
    %41 = tpu.matmul %35, %7, %cst_15 {dimension_numbers = #tpu.dot_dimension_numbers<[1], [1], [0], [0], [0, 0, 1, 0], [], []>} : vector<1x256xf32>, vector<8x256xf32>, vector<1x8xf32> -> vector<1x8xf32>
    %42 = vector.broadcast %40 : f32 to vector<1x8xf32>
    %43 = arith.mulf %41, %42 : vector<1x8xf32>
    %cst_16 = arith.constant dense<0.000000e+00> : vector<1x256xf32>
    %44 = tpu.matmul %43, %7, %cst_16 {dimension_numbers = #tpu.dot_dimension_numbers<[1], [0], [0], [1], [0, 0, 1, 1], [], []>} : vector<1x8xf32>, vector<8x256xf32>, vector<1x256xf32> -> vector<1x256xf32>
    %cst_17 = arith.constant 2.000000e+00 : f32
    %45 = vector.broadcast %cst_17 : f32 to vector<1x256xf32>
    %46 = arith.mulf %45, %44 : vector<1x256xf32>
    %47 = arith.subf %10, %46 : vector<1x256xf32>
    %48 = arith.mulf %43, %43 : vector<1x8xf32>
    %49 = vector.shape_cast %48 : vector<1x8xf32> to vector<1x1x8xf32>
    %cst_18 = arith.constant dense<0.000000e+00> : vector<1xf32>
    %50 = vector.multi_reduction <add>, %49, %cst_18 [1, 2] : vector<1x1x8xf32> to vector<1xf32>
    %51 = vector.shape_cast %50 : vector<1xf32> to vector<1x1x1xf32>
    %52 = vector.extract %51[0, 0, 0] : f32 from vector<1x1x1xf32>
    %53 = vector.broadcast %52 : f32 to vector<1x256xf32>
    %54 = arith.addf %47, %53 : vector<1x256xf32>
    %cst_19 = arith.constant 0.000000e+00 : f32
    %55 = vector.broadcast %cst_19 : f32 to vector<1x256xf32>
    %56 = arith.maximumf %54, %55 : vector<1x256xf32>
    %cst_20 = arith.constant 1.000000e-10 : f32
    %57 = vector.broadcast %cst_20 : f32 to vector<1x256xf32>
    %58 = arith.addf %56, %57 : vector<1x256xf32>
    %59 = math.rsqrt %58 : vector<1x256xf32>
    %60 = vector.shape_cast %59 : vector<1x256xf32> to vector<1x1x256xf32>
    %cst_21 = arith.constant dense<0.000000e+00> : vector<1xf32>
    %61 = vector.multi_reduction <add>, %60, %cst_21 [1, 2] : vector<1x1x256xf32> to vector<1xf32>
    %62 = vector.shape_cast %61 : vector<1xf32> to vector<1x1x1xf32>
    %63 = vector.extract %62[0, 0, 0] : f32 from vector<1x1x1xf32>
    %cst_22 = arith.constant 1.000000e+00 : f32
    %64 = arith.divf %cst_22, %63 : f32
    %cst_23 = arith.constant dense<0.000000e+00> : vector<1x8xf32>
    %65 = tpu.matmul %59, %7, %cst_23 {dimension_numbers = #tpu.dot_dimension_numbers<[1], [1], [0], [0], [0, 0, 1, 0], [], []>} : vector<1x256xf32>, vector<8x256xf32>, vector<1x8xf32> -> vector<1x8xf32>
    %66 = vector.broadcast %64 : f32 to vector<1x8xf32>
    %67 = arith.mulf %65, %66 : vector<1x8xf32>
    %cst_24 = arith.constant dense<0.000000e+00> : vector<1x256xf32>
    %68 = tpu.matmul %67, %7, %cst_24 {dimension_numbers = #tpu.dot_dimension_numbers<[1], [0], [0], [1], [0, 0, 1, 1], [], []>} : vector<1x8xf32>, vector<8x256xf32>, vector<1x256xf32> -> vector<1x256xf32>
    %cst_25 = arith.constant 2.000000e+00 : f32
    %69 = vector.broadcast %cst_25 : f32 to vector<1x256xf32>
    %70 = arith.mulf %69, %68 : vector<1x256xf32>
    %71 = arith.subf %10, %70 : vector<1x256xf32>
    %72 = arith.mulf %67, %67 : vector<1x8xf32>
    %73 = vector.shape_cast %72 : vector<1x8xf32> to vector<1x1x8xf32>
    %cst_26 = arith.constant dense<0.000000e+00> : vector<1xf32>
    %74 = vector.multi_reduction <add>, %73, %cst_26 [1, 2] : vector<1x1x8xf32> to vector<1xf32>
    %75 = vector.shape_cast %74 : vector<1xf32> to vector<1x1x1xf32>
    %76 = vector.extract %75[0, 0, 0] : f32 from vector<1x1x1xf32>
    %77 = vector.broadcast %76 : f32 to vector<1x256xf32>
    %78 = arith.addf %71, %77 : vector<1x256xf32>
    %cst_27 = arith.constant 0.000000e+00 : f32
    %79 = vector.broadcast %cst_27 : f32 to vector<1x256xf32>
    %80 = arith.maximumf %78, %79 : vector<1x256xf32>
    %cst_28 = arith.constant 1.000000e-10 : f32
    %81 = vector.broadcast %cst_28 : f32 to vector<1x256xf32>
    %82 = arith.addf %80, %81 : vector<1x256xf32>
    %83 = math.rsqrt %82 : vector<1x256xf32>
    %cst_29 = arith.constant dense<0.000000e+00> : vector<1x8xf32>
    %84 = tpu.matmul %83, %1, %cst_29 {dimension_numbers = #tpu.dot_dimension_numbers<[1], [1], [0], [0], [0, 0, 1, 0], [], []>} : vector<1x256xf32>, vector<8x256xf32>, vector<1x8xf32> -> vector<1x8xf32>
    %85 = vector.shape_cast %83 : vector<1x256xf32> to vector<1x1x256xf32>
    %cst_30 = arith.constant dense<0.000000e+00> : vector<1xf32>
    %86 = vector.multi_reduction <add>, %85, %cst_30 [1, 2] : vector<1x1x256xf32> to vector<1xf32>
    %87 = vector.shape_cast %86 : vector<1xf32> to vector<1x1x1xf32>
    %88 = vector.extract %87[0, 0, 0] : f32 from vector<1x1x1xf32>
    %cst_31 = arith.constant 1.000000e+00 : f32
    %89 = arith.divf %cst_31, %88 : f32
    %90 = vector.broadcast %89 : f32 to vector<1x8xf32>
    %91 = arith.mulf %84, %90 : vector<1x8xf32>
    %c0_32 = arith.constant 0 : index
    %c0_33 = arith.constant 0 : index
    %c0_34 = arith.constant 0 : index
    %92 = vector.load %arg2[%c0_32, %c0_33, %c0_34] : memref<1x1x8xf32, #tpu.memory_space<vmem>>, vector<1x1x8xf32>
    %93 = vector.shape_cast %92 : vector<1x1x8xf32> to vector<1x8xf32>
    %94 = vector.shape_cast %91 : vector<1x8xf32> to vector<1x1x8xf32>
    tpu.vector_store %arg2[%c0_32, %c0_33, %c0_34], %94 {strides = array<i32>} : memref<1x1x8xf32, #tpu.memory_space<vmem>>, vector<1x1x8xf32>,
    return
  }
  func.func @transform_0(%arg0: i32) -> (i32, i32, i32) {
    %c0_i32 = arith.constant 0 : i32
    %c0_i32_0 = arith.constant 0 : i32
    %c0_i32_1 = arith.constant 0 : i32
    return %arg0, %c0_i32, %c0_i32_0 : i32, i32, i32
  }
  func.func @transform_1(%arg0: i32) -> (i32, i32, i32) {
    %c0_i32 = arith.constant 0 : i32
    %c0_i32_0 = arith.constant 0 : i32
    %c0_i32_1 = arith.constant 0 : i32
    return %arg0, %c0_i32, %c0_i32_0 : i32, i32, i32
  }
}

</mosaic_0001>

<bundles_post_ra>
// kernel: tpu_custom_call.1
= control target key start
LH: loop header
LB: loop body
LE: loop exit
PB: predicated region body
PF: predicated region fallthrough
CT: control target
= control target key end

     0   :  { %6 = vsyncpa [#allocation3], 0  ;;  %s1305_s0 = inlined_call_operand.hbm [shape: f32[2,8,256], index: 0, kind: input, shape index: {}]   ;;  %s1306_s1 = inlined_call_operand.hbm [shape: f32[2,1,8], index: 1, kind: output, shape index: {}]  }
   0x1   :  { %8 = vsyncpa [#allocation3 + $0x1], 0 }
   0x2   :  { %9 = vsyncpa [#allocation4], 0 }
   0x3   :  { %11 = vsyncpa [#allocation4 + $0x1], 0  ;;  %s1095_s6 = smov 0   ;;  %s1097_s7 = smov 0  }
   0x4   :  { %s1099_s8 = smov 0   ;;  %s1101_s9 = smov 0  }
   0x5 LB: > { %s1116_s10 = sadd.s32 4294967295, %s1079_s9   ;;  %s878_s11 = sadd.s32 4294967294, %s1079_s9   ;;  %s1079_s9 = sphi %s1101_s9, %s1321_s9   ;;  %s1075_s8 = sphi %s1099_s8, %s1320_s8   ;;  %s1071_s7 = sphi %s1097_s7, %s1319_s7   ;;  %s1067_s6 = sphi %s1095_s6, %s1318_s6  }
   0x6   : > { %s1120_s12 = sadd.s32 1, %s1079_s9   ;;  %s24_s13 = sadd.s32 1, %s1075_s8 }
   0x7   : > { %s21_s14 = ssub.s32 %s1079_s9, %s1120_s12  ;;  %p31_p0 = scmp.ne.s32.totalorder %s1075_s8, %s1071_s7 }
   0x8   : > { %p22_p1 = scmp.eq.s32.totalorder %s21_s14, 0  ;;  %p32_p2 = scmp.eq.s32.totalorder %s1079_s9, 0 }
   0x9   : > { %p37_p3 = scmp.ne.s32.totalorder %s1071_s7, %s1067_s6  ;;  %p38_p4 = scmp.eq.s32.totalorder %s1116_s10, 0 }
   0xa   : > { %s1132_s15 = scalar_select %p22_p1, %s1075_s8, %s24_s13  }
   0xb   : > { %p1134_p5 = por %p32_p2, %p31_p0  ;;  %p1138_p6 = por %p38_p4, %p37_p3 }
   0xc   : > { %p61_p7 = scmp.eq.s32.totalorder %s1116_s10, 1  ;;  %p67_p8 = scmp.eq.s32.totalorder %s878_s11, 1 }
   0xd   : > { %p927_p10 = scmp.lt.s32.totalorder %s1079_s9, 2  ;;  %s87_s20 = sand.u32 1, %s1075_s8  }
   0xe   : > { %p1145_p11 = por %p61_p7, %p31_p0  ;;  %p1149_p12 = por %p67_p8, %p37_p3 }
   0xf   : > { %s892_s21 = sshll.u32 %s1079_s9, 8  ;;  %s881_s22 = sshll.u32 %s87_s20, 4 }
  0x10   : > { %s1310_s18 = scalar_select %p1145_p11, 1, 0 }
  0x11   : > { %s1311_s19 = scalar_select %p1149_p12, 1, 0 }
  0x12   : > { %s1158_s25 = scalar_lea.hbm %s1305_s0, %s892_s21  ;;  %s91_s26 = scalar_lea.vmem [#allocation2], %s881_s22 }
  0x13   : > { %s99_s27 = sshll.u32 %s91_s26, 4  ;;  %p1162_p13 = pnand %p927_p10, %p1134_p5  ;;  %s1166_s27 = int_to_ptr.vmem [resolvable:$true] %s99_s27 }
  0x14   : > { %s88_s29 = scalar_lea.sflag [#allocation3], %s87_s20  ;;  %s983_s30 = scalar_lea.hbm %s1158_s25, 256 }
  0x15   : > { %p984_p2 = scmp.ne.s32.totalorder %s1158_s25, %s983_s30  ;;  %p985_p3 = pneg %p1162_p13 }
  0x16   : > { %s988_s4 = scalar_lea.hbm %s1305_s0, 512  ;;  %p989_p5 = scmp.lt.u32.totalorder %s1158_s25, %s1305_s0 }
  0x17   : > { %p986_p4 = pnand %p985_p3, %p984_p2  ;;  %p990_p8 = scmp.lt.u32.totalorder %s988_s4, %s983_s30 }
  0x18   : > { %p992_p9 = scmp.lt.u32.totalorder %s983_s30, %s1158_s25 }
  0x19   : > { %p987_p7 = pneg %p986_p4  ;;  %p991_p10 = por %p990_p8, %p989_p5 }
  0x1b   : > { %p993_p0 = por %p992_p9, %p991_p10 }
  0x1d   : > { %p994_p1 = pnand %p993_p0, %p987_p7 }
  0x1f   : > { %997 = shalt.err (!%p994_p1)
}
  0x20   : > { %s998_s13 = scalar_lea.vmem %s1166_s27, 256  ;;  %s1081_s14 = smov [#allocation2]  }
  0x21   : > { %p999_p2 = scmp.ne.s32.totalorder %s1166_s27, %s998_s13  ;;  %s1003_s16 = sshll.u32 %s1081_s14, 4  ;;  %s1004_s16 = int_to_ptr.vmem [resolvable:$false] %s1003_s16 }
  0x22   : > { %s1005_s20 = scalar_lea.vmem %s1004_s16, 512  ;;  %p1006_p11 = scmp.lt.s32.totalorder %s1166_s27, %s1004_s16 }
  0x23   : > { %p1001_p4 = pnand %p999_p2, %p985_p3  ;;  %p1007_p5 = scmp.lt.s32.totalorder %s1005_s20, %s998_s13 }
  0x25   : > { %p1002_p12 = pneg %p1001_p4  ;;  %p1008_p8 = por %p1007_p5, %p1006_p11 }
  0x27   : > { %p1009_p9 = pnand %p1008_p8, %p1002_p12 }
  0x29   : > { %1012 = shalt.err (!%p1009_p9)
}
  0x2a   : > { %922 = dma.hbm_to_vmem [thread:$0]  (!%p1162_p13), %s1158_s25, 256, %s1166_s27, %s88_s29  }
  0x2b   : > { %p1313_p0 = scmp.lt.s32.totalorder %s1079_s9, 3  ;;  %p1314_p1 = scmp.ge.s32.totalorder %s1079_s9, 1 }
  0x2d   : > { %p105_p3 = pnand %p1314_p1, %p1313_p0 }
  0x2e   : > { %s1200_s21 = sand.u32 (!%p105_p3), 1, %s1071_s7  }
  0x2f   : > { %108 = sbr.rel (%p105_p3) target bundleno = 1954 (0x7a2), region = 24  ;;  %s885_s22 = sshll.u32 (!%p105_p3), %s1200_s21, 4 }
  0x30   : > { %s111_s23 = scalar_lea.sflag (!%p105_p3), [#allocation3], %s1200_s21  ;;  %s114_s24 = scalar_lea.vmem (!%p105_p3), [#allocation2], %s885_s22 }
  0x36   : > { %1058 = dma.done.wait (%p1138_p6), %s111_s23, 256  }
  0x37   : > { %1060 = vsyncadd (%p1138_p6), %s111_s23, 4294967040  ;;  %v1082_v0 = vmov 0.0   ;;  %vm154_vm0 = vcmask 1040384   ;;  %v1209_v1 = vld [vmem:[%s114_s24] sm:$0xff]  ;;  %v1211_v2 = vld [vmem:[%s114_s24 + $0x8] sm:$0xff]  ;;  %v1083_v6 = vmov 1.0  }
  0x38   : > { %309 = vmatprep.mubr.f32.mxu1 %v1082_v0  ;;  %v155_v3 = vsel %vm154_vm0, 1.0, %v1082_v0  ;;  %v134_v4 = vadd.f32 %v1211_v2, %v1209_v1  ;;  %233 = vmatprep.mubr.f32.mxu0 %v1083_v6  ;;  %vm241_vm1 = vcmask 64512   ;;  %vm321_vm2 = vcmask 57344   ;;  %s889_s5 = sshll.u32 %s1116_s10, 4  ;;  %s131_s11 = scalar_lea.vmem [#allocation5], %s1200_s21 }
  0x39   : > { %v156_v5 = vadd.f32 %v155_v3, %v155_v3  ;;  %s812_s13 = sshll.u32 %s131_s11, 4  ;;  %s1260_s22 = scalar_lea.hbm %s1306_s1, %s889_s5  ;;  %s1262_s13 = int_to_ptr.vmem [resolvable:$true] %s812_s13 }
  0x3a   : > { %135 = vadd.xlane.f32.xlu0 %v134_v4  ;;  %s800_s23 = scalar_lea.sflag [#allocation4], %s1200_s21  ;;  %s1013_s24 = scalar_lea.vmem %s1262_s13, 16 }
  0x3b   : > { %p1014_p6 = scmp.ne.s32.totalorder %s1262_s13, %s1013_s24  ;;  %p1315_p11 = scmp.ne.s32.totalorder %s1310_s18, 0 }
  0x3c   : > { %s1084_s10 = smov [#allocation5]  }
  0x3d   : > { %p1015_p12 = pnand %p1014_p6, %p1315_p11 }
  0x3e   : > { %157 = vadd.xlane.f32.xlu0 %v156_v5 }
  0x3f   : > { %p1016_p13 = pneg %p1015_p12 }
  0xc7   : > { %v136_v7 = vpop.xlane.xlu0 %135 }
  0xc8   : > { %v137_v8 = vmul.f32 0.00390625, %v136_v7 }
  0xca   : > { %v1218_v9 = vsub.f32 %v1209_v1, %v137_v8  ;;  %v139_v10 = vsub.f32 %v1211_v2, %v137_v8 }
  0xcb   : > { %v158_v11 = vpop.xlane.xlu0 %157 }
  0xcc   : > { %169 = vmatprep.subr.mxu0 %v139_v10  ;;  %245 = vmatprep.subr.mxu1 %v139_v10  ;;  %v159_v12 = vrot.slane %v158_v11, 4  ;;  %v140_v33 = vmul.f32 %v1218_v9, %v1218_v9  ;;  %v141_v34 = vmul.f32 %v139_v10, %v139_v10 }
  0xcd   : > { %170 = vmatpush1.xpose.msra.mxu0 %v1218_v9  ;;  %246 = vmatpush1.msra.mxu1 %v1218_v9 }
  0xce   : > { %356 = vmatprep.subr.mxu1 %v139_v10  ;;  %431 = vmatprep.subr.mxu0 %v139_v10  ;;  %v160_v13 = vadd.f32 %v159_v12, %v158_v11  ;;  %v142_v35 = vrot.slane %v140_v33, 4  ;;  %v148_v36 = vrot.slane %v141_v34, 4 }
  0xd0   : > { %234 = vmatmul.mubr.f32.vlgmr.msra.gmra.mrb[0].mxu0 %v1083_v6  ;;  %v161_v14 = vrot.slane %v160_v13, 2  ;;  %v143_v37 = vadd.f32 %v142_v35, %v140_v33  ;;  %v149_v38 = vadd.f32 %v148_v36, %v141_v34 }
  0xd1   : > { %432 = vmatpush1.msra.mxu0 %v1218_v9  ;;  %495 = vmatprep.mubr.f32.mxu0 %v1082_v0 }
  0xd2   : > { %616 = vmatprep.subr.mxu0 %v139_v10  ;;  %v162_v15 = vadd.f32 %v161_v14, %v160_v13  ;;  %v144_v39 = vrot.slane %v143_v37, 2  ;;  %v150_v40 = vrot.slane %v149_v38, 2 }
  0xd4   : > { %v163_v16 = vrot.slane %v162_v15, 1  ;;  %v145_v41 = vadd.f32 %v144_v39, %v143_v37  ;;  %v151_v42 = vadd.f32 %v150_v40, %v149_v38 }
  0xd6   : > { %v164_v17 = vadd.f32 %v163_v16, %v162_v15  ;;  %v146_v43 = vrot.slane %v145_v41, 1  ;;  %v152_v44 = vrot.slane %v151_v42, 1 }
  0xd8   : > { %893 = vpush %v164_v17  ;;  %v1230_v46 = vadd.f32 %v146_v43, %v145_v41  ;;  %v1232_v49 = vadd.f32 %v152_v44, %v151_v42 }
 0x109   : > { %s894_s17 = spop %893 }
 0x10a   : > { %v166_v18 = vstv %s894_s17  ;;  %s1017_s17 = sshll.u32 %s1084_s10, 4  ;;  %s1018_s17 = int_to_ptr.vmem [resolvable:$false] %s1017_s17 }
 0x10b   : > { %963 = vrcp.f32 %v166_v18  ;;  %p1020_p7 = scmp.lt.s32.totalorder %s1262_s13, %s1018_s17 }
 0x115   : > { %v964_v19 = vpop.eup %963 }
 0x116   : > { %895 = vpush %v964_v19 }
 0x147   : > { %s896_s25 = spop %895 }
 0x148   : > { %v239_v20 = vstv %s896_s25  ;;  %s1019_s25 = scalar_lea.vmem %s1018_s17, 32 }
 0x149   : > { %p1021_p10 = scmp.lt.s32.totalorder %s1019_s25, %s1013_s24 }
 0x14b   : > { %p1022_p2 = por %p1021_p10, %p1020_p7 }
 0x14d   : > { %p1023_p4 = pnand %p1022_p2, %p1016_p13 }
 0x1a3   : > { %v235_v21 = vpop.f32.mrb[0].mxu0 }
 0x1a4   : > { %v240_v22 = vmul.f32 %v239_v20, %v235_v21  ;;  %v237_v23 = vpop.f32.mrb[1].mxu0 }
 0x1a6   : > { %886 = vmatmul.mubr.msk.f32.vlgmr.msra.gmra.mrb[0].mxu1 %vm241_vm1, %v240_v22  ;;  %v320_v24 = vmul.f32 %v240_v22, %v240_v22 }
 0x1a7   : > { %357 = vmatpush1.xpose.msra.mxu1 %v1218_v9 }
 0x1a8   : > { %541 = vmatprep.subr.mxu1 %v139_v10  ;;  %v322_v25 = vsel %vm321_vm2, %v320_v24, 0.0 }
 0x1a9   : > { %323 = vadd.xlane.f32.xlu1 %v322_v25 }
 0x236   : > { %v324_v26 = vpop.xlane.xlu1 %323 }
 0x237   : > { %v325_v27 = vrot.slane %v324_v26, 4 }
 0x239   : > { %v326_v28 = vadd.f32 %v325_v27, %v324_v26 }
 0x23b   : > { %v327_v29 = vrot.slane %v326_v28, 2 }
 0x23d   : > { %v328_v30 = vadd.f32 %v327_v29, %v326_v28 }
 0x23f   : > { %v329_v31 = vrot.slane %v328_v30, 1 }
 0x241   : > { %v330_v32 = vadd.f32 %v329_v31, %v328_v30 }
 0x243   : > { %897 = vpush %v330_v32 }
 0x274   : > { %s898_s26 = spop %897 }
 0x275   : > { %v332_v52 = vstv %s898_s26 }
 0x279   : > { %v311_v45 = vpop.f32.mrb[0].mxu1 }
 0x27a   : > { %v316_v47 = vmul.f32 2.0, %v311_v45  ;;  %v313_v48 = vpop.f32.mrb[1].mxu1 }
 0x27b   : > { %v317_v50 = vmul.f32 2.0, %v313_v48 }
 0x27c   : > { %v318_v51 = vsub.f32 %v1230_v46, %v316_v47 }
 0x27d   : > { %v319_v53 = vsub.f32 %v1232_v49, %v317_v50 }
 0x27e   : > { %v333_v54 = vadd.f32 %v332_v52, %v318_v51 }
 0x27f   : > { %v334_v55 = vadd.f32 %v332_v52, %v319_v53 }
 0x280   : > { %v335_v56 = vmax.f32 %v333_v54, 0.0 }
 0x281   : > { %v336_v57 = vmax.f32 %v334_v55, 0.0 }
 0x282   : > { %v337_v58 = vadd.f32 1e-10, %v335_v56 }
 0x283   : > { %v338_v59 = vadd.f32 1e-10, %v336_v57 }
 0x284   : > { %965 = vrsqrt.f32 %v337_v58 }
 0x285   : > { %967 = vrsqrt.f32 %v338_v59 }
 0x28e   : > { %v966_v60 = vpop.eup %965 }
 0x28f   : > { %v968_v61 = vpop.eup %967  ;;  %v341_v62 = vsel %vm154_vm0, %v966_v60, 0.0 }
 0x290   : > { %420 = vmatprep.mubr.f32.mxu1 %v968_v61  ;;  %v342_v63 = vsel %vm154_vm0, %v968_v61, 0.0 }
 0x291   : > { %421 = vmatmul.mubr.f32.vlgmr.msra.gmra.mrb[2].mxu1 %v966_v60  ;;  %v343_v3 = vadd.f32 %v342_v63, %v341_v62 }
 0x292   : > { %542 = vmatpush1.xpose.msra.mxu1 %v1218_v9 }
 0x293   : > { %344 = vadd.xlane.f32.xlu1 %v343_v3  ;;  %711 = vmatprep.subr.mxu1 %v1211_v2 }
 0x320   : > { %v345_v4 = vpop.xlane.xlu1 %344 }
 0x321   : > { %v346_v5 = vrot.slane %v345_v4, 4 }
 0x323   : > { %v347_v6 = vadd.f32 %v346_v5, %v345_v4 }
 0x325   : > { %v348_v7 = vrot.slane %v347_v6, 2 }
 0x327   : > { %v349_v8 = vadd.f32 %v348_v7, %v347_v6 }
 0x329   : > { %v350_v10 = vrot.slane %v349_v8, 1 }
 0x32b   : > { %v351_v11 = vadd.f32 %v350_v10, %v349_v8 }
 0x32d   : > { %899 = vpush %v351_v11 }
 0x35e   : > { %s900_s27 = spop %899 }
 0x35f   : > { %v353_v12 = vstv %s900_s27 }
 0x360   : > { %969 = vrcp.f32 %v353_v12 }
 0x364   : > { %v422_v13 = vpop.f32.mrb[2].mxu1 }
 0x365   : > { %v424_v14 = vpop.f32.mrb[3].mxu1 }
 0x36a   : > { %v970_v15 = vpop.eup %969 }
 0x36b   : > { %901 = vpush %v970_v15 }
 0x39c   : > { %s902_s28 = spop %901 }
 0x39d   : > { %v426_v16 = vstv %s902_s28 }
 0x39e   : > { %v427_v17 = vmul.f32 %v426_v16, %v422_v13 }
 0x3a0   : > { %887 = vmatmul.mubr.msk.f32.vlgmr.msra.gmra.mrb[2].mxu0 %vm241_vm1, %v427_v17  ;;  %v506_v2 = vmul.f32 %v427_v17, %v427_v17 }
 0x3a1   : > { %617 = vmatpush1.msra.mxu0 %v1218_v9  ;;  %680 = vmatprep.mubr.f32.mxu0 %v1082_v0 }
 0x3a2   : > { %v507_v18 = vsel %vm321_vm2, %v506_v2, 0.0 }
 0x3a3   : > { %508 = vadd.xlane.f32.xlu0 %v507_v18 }
 0x430   : > { %v509_v19 = vpop.xlane.xlu0 %508 }
 0x431   : > { %v510_v20 = vrot.slane %v509_v19, 4 }
 0x433   : > { %v511_v21 = vadd.f32 %v510_v20, %v509_v19 }
 0x435   : > { %v512_v22 = vrot.slane %v511_v21, 2 }
 0x437   : > { %v513_v23 = vadd.f32 %v512_v22, %v511_v21 }
 0x439   : > { %v514_v24 = vrot.slane %v513_v23, 1 }
 0x43b   : > { %v515_v25 = vadd.f32 %v514_v24, %v513_v23 }
 0x43d   : > { %903 = vpush %v515_v25 }
 0x46e   : > { %s904_s29 = spop %903 }
 0x46f   : > { %v517_v30 = vstv %s904_s29 }
 0x473   : > { %v497_v26 = vpop.f32.mrb[2].mxu0 }
 0x474   : > { %v502_v27 = vmul.f32 2.0, %v497_v26  ;;  %v499_v28 = vpop.f32.mrb[3].mxu0 }
 0x475   : > { %v503_v29 = vmul.f32 2.0, %v499_v28 }
 0x476   : > { %v504_v9 = vsub.f32 %v1230_v46, %v502_v27 }
 0x477   : > { %v505_v0 = vsub.f32 %v1232_v49, %v503_v29 }
 0x478   : > { %v518_v31 = vadd.f32 %v517_v30, %v504_v9 }
 0x479   : > { %v519_v32 = vadd.f32 %v517_v30, %v505_v0 }
 0x47a   : > { %v520_v33 = vmax.f32 %v518_v31, 0.0 }
 0x47b   : > { %v521_v34 = vmax.f32 %v519_v32, 0.0 }
 0x47c   : > { %v522_v35 = vadd.f32 1e-10, %v520_v33 }
 0x47d   : > { %v523_v36 = vadd.f32 1e-10, %v521_v34 }
 0x47e   : > { %971 = vrsqrt.f32 %v522_v35 }
 0x47f   : > { %973 = vrsqrt.f32 %v523_v36 }
 0x488   : > { %v972_v37 = vpop.eup %971 }
 0x489   : > { %v974_v38 = vpop.eup %973  ;;  %v526_v39 = vsel %vm154_vm0, %v972_v37, 0.0 }
 0x48a   : > { %605 = vmatprep.mubr.f32.mxu1 %v974_v38  ;;  %v527_v40 = vsel %vm154_vm0, %v974_v38, 0.0 }
 0x48b   : > { %606 = vmatmul.mubr.f32.vlgmr.msra.gmra.mrb[4].mxu1 %v972_v37  ;;  %v528_v41 = vadd.f32 %v527_v40, %v526_v39 }
 0x48c   : > { %712 = vmatpush1.xpose.msra.mxu1 %v1209_v1 }
 0x48d   : > { %529 = vadd.xlane.f32.xlu1 %v528_v41 }
 0x51a   : > { %v530_v42 = vpop.xlane.xlu1 %529 }
 0x51b   : > { %v531_v43 = vrot.slane %v530_v42, 4 }
 0x51d   : > { %v532_v44 = vadd.f32 %v531_v43, %v530_v42 }
 0x51f   : > { %v533_v45 = vrot.slane %v532_v44, 2 }
 0x521   : > { %v534_v47 = vadd.f32 %v533_v45, %v532_v44 }
 0x523   : > { %v535_v48 = vrot.slane %v534_v47, 1 }
 0x525   : > { %v536_v50 = vadd.f32 %v535_v48, %v534_v47 }
 0x527   : > { %905 = vpush %v536_v50 }
 0x558   : > { %s906_s30 = spop %905 }
 0x559   : > { %v538_v51 = vstv %s906_s30 }
 0x55a   : > { %975 = vrcp.f32 %v538_v51 }
 0x55e   : > { %v607_v52 = vpop.f32.mrb[4].mxu1 }
 0x55f   : > { %v609_v53 = vpop.f32.mrb[5].mxu1 }
 0x564   : > { %v976_v54 = vpop.eup %975 }
 0x565   : > { %907 = vpush %v976_v54 }
 0x596   : > { %s908_s2 = spop %907 }
 0x597   : > { %v611_v55 = vstv %s908_s2 }
 0x598   : > { %v612_v56 = vmul.f32 %v611_v55, %v607_v52 }
 0x59a   : > { %888 = vmatmul.mubr.msk.f32.vlgmr.msra.gmra.mrb[4].mxu0 %vm241_vm1, %v612_v56  ;;  %v691_v1 = vmul.f32 %v612_v56, %v612_v56 }
 0x59c   : > { %v692_v57 = vsel %vm321_vm2, %v691_v1, 0.0 }
 0x59d   : > { %693 = vadd.xlane.f32.xlu0 %v692_v57 }
 0x62a   : > { %v694_v58 = vpop.xlane.xlu0 %693 }
 0x62b   : > { %v695_v59 = vrot.slane %v694_v58, 4 }
 0x62d   : > { %v696_v60 = vadd.f32 %v695_v59, %v694_v58 }
 0x62f   : > { %v697_v61 = vrot.slane %v696_v60, 2 }
 0x631   : > { %v698_v62 = vadd.f32 %v697_v61, %v696_v60 }
 0x633   : > { %v699_v63 = vrot.slane %v698_v62, 1 }
 0x635   : > { %v700_v3 = vadd.f32 %v699_v63, %v698_v62 }
 0x637   : > { %909 = vpush %v700_v3 }
 0x668   : > { %s910_s3 = spop %909 }
 0x669   : > { %v702_v10 = vstv %s910_s3 }
 0x66d   : > { %v682_v4 = vpop.f32.mrb[4].mxu0 }
 0x66e   : > { %v687_v5 = vmul.f32 2.0, %v682_v4  ;;  %v684_v6 = vpop.f32.mrb[5].mxu0 }
 0x66f   : > { %v688_v7 = vmul.f32 2.0, %v684_v6 }
 0x670   : > { %v689_v8 = vsub.f32 %v1230_v46, %v687_v5 }
 0x671   : > { %v690_v11 = vsub.f32 %v1232_v49, %v688_v7 }
 0x672   : > { %v703_v12 = vadd.f32 %v702_v10, %v689_v8 }
 0x673   : > { %v704_v13 = vadd.f32 %v702_v10, %v690_v11 }
 0x674   : > { %v705_v14 = vmax.f32 %v703_v12, 0.0 }
 0x675   : > { %v706_v15 = vmax.f32 %v704_v13, 0.0 }
 0x676   : > { %v707_v16 = vadd.f32 1e-10, %v705_v14 }
 0x677   : > { %v708_v17 = vadd.f32 1e-10, %v706_v15 }
 0x678   : > { %977 = vrsqrt.f32 %v707_v16 }
 0x679   : > { %979 = vrsqrt.f32 %v708_v17 }
 0x682   : > { %v978_v2 = vpop.eup %977 }
 0x683   : > { %v980_v18 = vpop.eup %979  ;;  %v781_v19 = vsel %vm154_vm0, %v978_v2, 0.0 }
 0x684   : > { %775 = vmatprep.mubr.f32.mxu1 %v980_v18  ;;  %v782_v20 = vsel %vm154_vm0, %v980_v18, 0.0 }
 0x685   : > { %776 = vmatmul.mubr.f32.vlgmr.msra.gmra.mrb[6].mxu1 %v978_v2  ;;  %v783_v46 = vadd.f32 %v782_v20, %v781_v19 }
 0x687   : > { %784 = vadd.xlane.f32.xlu1 %v783_v46 }
 0x714   : > { %v785_v49 = vpop.xlane.xlu1 %784 }
 0x715   : > { %v786_v21 = vrot.slane %v785_v49, 4 }
 0x717   : > { %v787_v22 = vadd.f32 %v786_v21, %v785_v49 }
 0x719   : > { %v788_v23 = vrot.slane %v787_v22, 2 }
 0x71b   : > { %v789_v24 = vadd.f32 %v788_v23, %v787_v22 }
 0x71d   : > { %v790_v25 = vrot.slane %v789_v24, 1 }
 0x71f   : > { %v791_v26 = vadd.f32 %v790_v25, %v789_v24 }
 0x721   : > { %911 = vpush %v791_v26 }
 0x752   : > { %s912_s4 = spop %911 }
 0x753   : > { %v793_v27 = vstv %s912_s4 }
 0x754   : > { %981 = vrcp.f32 %v793_v27 }
 0x758   : > { %v777_v28 = vpop.f32.mrb[6].mxu1 }
 0x759   : > { %v779_v29 = vpop.f32.mrb[7].mxu1 }
 0x75e   : > { %v982_v9 = vpop.eup %981 }
 0x75f   : > { %913 = vpush %v982_v9 }
 0x790   : > { %s914_s14 = spop %913 }
 0x791   : > { %v796_v30 = vstv %s914_s14 }
 0x792   : > { %v797_v0 = vmul.f32 %v796_v30, %v777_v28 }
 0x794   : > { %798 = vst.msk [vmem:[%s131_s11] sm:$0x1] %vm321_vm2, %v797_v0 }
 0x795   : > { %1026 = shalt.err (!%p1023_p4)
}
 0x796   : > { %s1027_s21 = scalar_lea.hbm %s1260_s22, 16  ;;  %s1031_s28 = scalar_lea.hbm %s1306_s1, 32 }
 0x797   : > { %p1028_p5 = scmp.ne.s32.totalorder %s1260_s22, %s1027_s21  ;;  %p1032_p0 = scmp.lt.u32.totalorder %s1260_s22, %s1306_s1 }
 0x798   : > { %p1033_p1 = scmp.lt.u32.totalorder %s1031_s28, %s1027_s21  ;;  %p1035_p6 = scmp.lt.u32.totalorder %s1027_s21, %s1260_s22 }
 0x799   : > { %p1029_p8 = pnand %p1028_p5, %p1315_p11 }
 0x79a   : > { %p1034_p3 = por %p1033_p1, %p1032_p0 }
 0x79b   : > { %p1030_p9 = pneg %p1029_p8 }
 0x79c   : > { %p1036_p12 = por %p1035_p6, %p1034_p3 }
 0x79e   : > { %p1037_p13 = pnand %p1036_p12, %p1030_p9 }
 0x7a0   : > { %1040 = shalt.err (!%p1037_p13)
}
 0x7a1   : > { %917 = dma.vmem_to_hbm [thread:$0]  (%p1315_p11), %s1262_s13, 16, %s1260_s22, %s800_s23  }
 0x7a2 PF: > { %s824_s2 = sand.u32 1, %s1067_s6   ;;  %p1316_p7 = scmp.ne.s32.totalorder %s1311_s19, 0 }
 0x7a3   : > { %p1317_p10 = scmp.ge.s32.totalorder %s1079_s9, 2  ;;  %s825_s3 = scalar_lea.sflag [#allocation4], %s824_s2 }
 0x7a5   : > { %p924_p2 = pnand %p1317_p10, %p1316_p7 }
 0x7a7   : > { %1062 = dma.done.wait (!%p924_p2), %s825_s3, 16  }
 0x7a8   : > { %1064 = vsyncadd (!%p924_p2), %s825_s3, 4294967280  ;;  %p14_p4 = scmp.ge.s32.totalorder %s1120_s12, 4   ;;  %s1318_s6 = smov %s1071_s7 }
 0x7a9   : > { %s1319_s7 = smov %s1075_s8  ;;  %s1320_s8 = smov %s1132_s15 }
 0x7aa   : > { %s1321_s9 = smov %s1120_s12  ;;  %16 = sbr.rel (!%p14_p4) target bundleno = 5 (0x5), region = 69 }
 0x7b1   :  { %829 = vsyncpa [#allocation3], 1 }
 0x7b2   :  { %831 = vsyncpa [#allocation3 + $0x1], 1 }
 0x7b3   :  { %832 = vsyncpa [#allocation4], 1 }
 0x7b4   :  { %834 = vsyncpa [#allocation4 + $0x1], 1 }

</bundles_post_ra>
